<compile_context>
chip_gen: v7x
topology: tpu7x:2x2x1
jax: 0.10.0
libtpu: 0.0.40
codegen_flags: <defaults>
</compile_context>

<pallas_src>
import functools
import math

import jax
import jax.numpy as jnp
from jax.experimental import pallas as pl
from jax.experimental.pallas import tpu as pltpu


_LANE = 128
_FUSED_MAX_NODES = 2048   # below this, both layers run in one pallas_call
_TM = 512                 # row tile (keeps i-extent >= 2 at n=1024 for v7x 2-TC)
_TK = 1024                # K (neighbor) tile
_VMEM_LIMIT = 48 * 1024 * 1024


def _round_up(x, m):
    return (x + m - 1) // m * m


def _pad2(x, rows, cols):
    return jnp.pad(x, ((0, rows - x.shape[0]), (0, cols - x.shape[1])))


# ----------------------------------------------------------------------------
# Fused two-layer kernel (small graphs: everything VMEM-resident, one launch)
# ----------------------------------------------------------------------------
def _sage_fused_kernel(a_ref, x_ref, invdeg_ref, w1l_ref, b1l_ref, w1r_ref,
                       w2l_ref, b2l_ref, w2r_ref, o_ref):
    a = a_ref[...]            # exact 0/1 counts, bf16
    x = x_ref[...]
    inv = invdeg_ref[...]     # f32 per-row 1/deg
    # layer 1: relu(lin_l(mean_agg(x)) + lin_r(x))
    agg1 = (jnp.dot(a, x, preferred_element_type=jnp.float32) * inv
            ).astype(jnp.bfloat16)
    h = (jnp.dot(agg1, w1l_ref[...], preferred_element_type=jnp.float32)
         + b1l_ref[...]
         + jnp.dot(x, w1r_ref[...], preferred_element_type=jnp.float32))
    h = jnp.maximum(h, 0.0).astype(jnp.bfloat16)
    # layer 2 (no relu)
    agg2 = (jnp.dot(a, h, preferred_element_type=jnp.float32) * inv
            ).astype(jnp.bfloat16)
    out = (jnp.dot(agg2, w2l_ref[...], preferred_element_type=jnp.float32)
           + b2l_ref[...]
           + jnp.dot(h, w2r_ref[...], preferred_element_type=jnp.float32))
    o_ref[...] = out.astype(o_ref.dtype)


def _gnn_fused_call(a, x, invdeg, w1l_t, b1l, w1r_t, w2l_t, b2l, w2r_t):
    n, hp = x.shape

    def full(shape):
        return pl.BlockSpec(shape, lambda i: (0,) * len(shape))

    return pl.pallas_call(
        _sage_fused_kernel,
        out_shape=jax.ShapeDtypeStruct((n, hp), jnp.float32),
        grid=(1,),
        in_specs=[
            full((n, n)), full((n, hp)), full((n, 1)),
            full((hp, hp)), full((1, hp)), full((hp, hp)),
            full((hp, hp)), full((1, hp)), full((hp, hp)),
        ],
        out_specs=full((n, hp)),
        compiler_params=pltpu.CompilerParams(
            dimension_semantics=("arbitrary",),
            vmem_limit_bytes=_VMEM_LIMIT,
        ),
    )(a, x, invdeg, w1l_t, b1l, w1r_t, w2l_t, b2l, w2r_t)


# ----------------------------------------------------------------------------
# Tiled single-layer kernel (large graphs: pipelined K-reduction, resident X)
# ----------------------------------------------------------------------------
def _sage_tiled_kernel(a_ref, x_ref, invdeg_ref, wl_ref, bl_ref, wr_ref,
                       o_ref, acc_ref, *, apply_relu, tm, tk):
    i = pl.program_id(0)
    k = pl.program_id(1)

    @pl.when(k == 0)
    def _():
        acc_ref[...] = jnp.zeros_like(acc_ref)

    # partial (unnormalized) aggregation: acc[i] += A01[i, k-tile] @ X[k-tile]
    xk = x_ref[pl.ds(pl.multiple_of(k * tk, tk), tk), :]
    acc_ref[...] += jnp.dot(a_ref[...], xk,
                            preferred_element_type=jnp.float32)

    # epilogue: 1/deg scaling, weights + bias (+relu) once per output tile
    @pl.when(k == pl.num_programs(1) - 1)
    def _():
        agg = (acc_ref[...] * invdeg_ref[...]).astype(jnp.bfloat16)
        xi = x_ref[pl.ds(pl.multiple_of(i * tm, tm), tm), :]
        out = (jnp.dot(agg, wl_ref[...], preferred_element_type=jnp.float32)
               + bl_ref[...]
               + jnp.dot(xi, wr_ref[...], preferred_element_type=jnp.float32))
        if apply_relu:
            out = jnp.maximum(out, 0.0)
        o_ref[...] = out.astype(o_ref.dtype)


def sage_conv_tiled(a01, x, invdeg, wl_t, bl, wr_t, *, apply_relu, out_dtype,
                    tm=_TM, tk=_TK):
    n = a01.shape[0]
    hp = x.shape[1]
    assert n % tm == 0 and n % tk == 0, (n, tm, tk)
    kernel = functools.partial(_sage_tiled_kernel, apply_relu=apply_relu,
                               tm=tm, tk=tk)
    return pl.pallas_call(
        kernel,
        out_shape=jax.ShapeDtypeStruct((n, hp), out_dtype),
        grid_spec=pltpu.PrefetchScalarGridSpec(
            num_scalar_prefetch=0,
            grid=(n // tm, n // tk),
            in_specs=[
                # streamed A tile, 3-deep so DMA rolls through the epilogue
                pl.BlockSpec((tm, tk), lambda i, k: (i, k),
                             pipeline_mode=pl.Buffered(3)),
                # X resident in VMEM for the whole grid (neighbor + root rows)
                pl.BlockSpec((n, hp), lambda i, k: (0, 0)),
                pl.BlockSpec((tm, 1), lambda i, k: (i, 0)),    # 1/deg rows
                pl.BlockSpec((hp, hp), lambda i, k: (0, 0)),   # W_l^T (resident)
                pl.BlockSpec((1, hp), lambda i, k: (0, 0)),    # b_l
                pl.BlockSpec((hp, hp), lambda i, k: (0, 0)),   # W_r^T (resident)
            ],
            out_specs=pl.BlockSpec((tm, hp), lambda i, k: (i, 0)),
            scratch_shapes=[pltpu.VMEM((tm, hp), jnp.float32)],
        ),
        compiler_params=pltpu.CompilerParams(
            dimension_semantics=("parallel", "arbitrary"),
            vmem_limit_bytes=_VMEM_LIMIT,
        ),
    )(a01, x, invdeg, wl_t, bl, wr_t)


# ----------------------------------------------------------------------------
# Glue: adjacency build, params, forward
# ----------------------------------------------------------------------------
def build_adjacency_counts(edge_index, num_nodes):
    """Dense 0/1 (edge-count) adjacency + per-row inverse in-degree.

    edge_index: [2, E] int, row 0 = source j, row 1 = target i.
    counts[i, j] = #edges j->i (exact small ints, stored bf16)
    inv_deg[i]   = 1 / max(in_degree(i), 1)   (f32, applied in the kernel)
    """
    src = edge_index[0]
    dst = edge_index[1]
    counts = jnp.zeros((num_nodes, num_nodes), jnp.bfloat16)
    counts = counts.at[dst, src].add(jnp.bfloat16(1.0))
    deg = jnp.zeros((num_nodes,), jnp.float32).at[dst].add(1.0)
    inv_deg = (1.0 / jnp.maximum(deg, 1.0)).reshape(num_nodes, 1)
    return counts, inv_deg


def init_params(key, hidden_channels):
    def glorot(k, shape):
        fan_in, fan_out = shape[1], shape[0]
        limit = jnp.sqrt(6.0 / (fan_in + fan_out))
        return jax.random.uniform(k, shape, jnp.float32, -limit, limit)

    ks = jax.random.split(key, 6)
    h = hidden_channels
    return {
        "conv1": {
            "w_l": glorot(ks[0], (h, h)),                                    # lin_l.weight
            "b_l": jax.random.uniform(ks[1], (h,), jnp.float32, -0.5, 0.5),  # lin_l.bias
            "w_r": glorot(ks[2], (h, h)),                                    # lin_r.weight
        },
        "conv2": {
            "w_l": glorot(ks[3], (h, h)),
            "b_l": jax.random.uniform(ks[4], (h,), jnp.float32, -0.5, 0.5),
            "w_r": glorot(ks[5], (h, h)),
        },
    }


def gnn_base_forward(params, x, edge_index, *, use_fused=None):
    n, h = x.shape
    hp = _round_up(h, _LANE)          # lane-dense feature dim
    a01, inv_deg = build_adjacency_counts(edge_index, n)

    def prep(p):
        wl_t = _pad2(p["w_l"], hp, hp).T.astype(jnp.bfloat16)
        wr_t = _pad2(p["w_r"], hp, hp).T.astype(jnp.bfloat16)
        bl = jnp.pad(p["b_l"], (0, hp - h)).reshape(1, hp).astype(jnp.float32)
        return wl_t, bl, wr_t

    w1l_t, b1l, w1r_t = prep(params["conv1"])
    w2l_t, b2l, w2r_t = prep(params["conv2"])

    fused = use_fused if use_fused is not None else (n <= _FUSED_MAX_NODES)

    if fused:
        n_p = _round_up(n, 16)        # bf16 sublane pack
        a_p = _pad2(a01, n_p, n_p)
        x_p = _pad2(x, n_p, hp).astype(jnp.bfloat16)
        inv_p = _pad2(inv_deg, n_p, 1)
        out = _gnn_fused_call(a_p, x_p, inv_p,
                              w1l_t, b1l, w1r_t, w2l_t, b2l, w2r_t)
    else:
        n_p = _round_up(n, math.lcm(_TM, _TK))
        a_p = _pad2(a01, n_p, n_p)
        x_p = _pad2(x, n_p, hp).astype(jnp.bfloat16)
        inv_p = _pad2(inv_deg, n_p, 1)
        # layer 1 emits bf16 directly (feeds layer 2 without a cast pass)
        h1 = sage_conv_tiled(a_p, x_p, inv_p, w1l_t, b1l, w1r_t,
                             apply_relu=True, out_dtype=jnp.bfloat16)
        out = sage_conv_tiled(a_p, h1, inv_p, w2l_t, b2l, w2r_t,
                              apply_relu=False, out_dtype=jnp.float32)

    return out[:n, :h]


def gnn_base_reference(params, x, edge_index):
    """Pure-JAX f32 reference matching the PyTorch module."""
    n = x.shape[0]
    src, dst = edge_index[0], edge_index[1]
    counts = jnp.zeros((n, n), jnp.float32).at[dst, src].add(1.0)
    deg = counts.sum(axis=1, keepdims=True)
    a = counts / jnp.maximum(deg, 1.0)

    def conv(p, xx):
        agg = a @ xx
        return agg @ p["w_l"].T + p["b_l"] + xx @ p["w_r"].T

    hid = jax.nn.relu(conv(params["conv1"], x))
    return conv(params["conv2"], hid)


if __name__ == "__main__":
    key = jax.random.PRNGKey(0)
    k_param, k_x, k_x2, k_e1, k_e2 = jax.random.split(key, 5)

    # --- test 1: small graph -> fused single-call path ----------------------
    hidden_channels, num_nodes = 32, 16
    params = init_params(k_param, hidden_channels)
    x = jax.random.normal(k_x, (num_nodes, hidden_channels), jnp.float32)
    idx = jnp.arange(num_nodes, dtype=jnp.int32)
    nxt = (idx + 1) % num_nodes
    edge_index = jnp.stack(
        [jnp.concatenate([idx, nxt]), jnp.concatenate([nxt, idx])], axis=0
    )

    out = gnn_base_forward(params, x, edge_index)
    jax.block_until_ready(out)
    assert out.shape == (num_nodes, hidden_channels)
    ref = gnn_base_reference(params, x, edge_index)
    err = float(jnp.max(jnp.abs(out - ref)))
    scale = float(jnp.max(jnp.abs(ref)))
    assert err <= 0.05 * scale + 0.05, ("fused path mismatch", err, scale)

    # --- test 2: larger graph -> tiled, pipelined, megacore-parallel path ---
    n2, e2 = 1024, 8192
    x2 = jax.random.normal(k_x2, (n2, hidden_channels), jnp.float32)
    src = jax.random.randint(k_e1, (e2,), 0, n2, jnp.int32)
    dst = jax.random.randint(k_e2, (e2,), 0, n2, jnp.int32)
    ei2 = jnp.stack([src, dst], axis=0)

    out2 = gnn_base_forward(params, x2, ei2, use_fused=False)
    jax.block_until_ready(out2)
    assert out2.shape == (n2, hidden_channels)
    ref2 = gnn_base_reference(params, x2, ei2)
    err2 = float(jnp.max(jnp.abs(out2 - ref2)))
    scale2 = float(jnp.max(jnp.abs(ref2)))
    assert err2 <= 0.05 * scale2 + 0.05, ("tiled path mismatch", err2, scale2)

    print("KERNEL_OK")
</pallas_src>

<mosaic_0001>
module attributes {stable_mosaic.version = 11 : i64} {
  func.func @_sage_fused_kernel(%arg0: i32, %arg1: memref<16x16xbf16, #tpu.memory_space<vmem>>, %arg2: memref<16x128xbf16, #tpu.memory_space<vmem>>, %arg3: memref<16x1xf32, #tpu.memory_space<vmem>>, %arg4: memref<128x128xbf16, #tpu.memory_space<vmem>>, %arg5: memref<1x128xf32, #tpu.memory_space<vmem>>, %arg6: memref<128x128xbf16, #tpu.memory_space<vmem>>, %arg7: memref<128x128xbf16, #tpu.memory_space<vmem>>, %arg8: memref<1x128xf32, #tpu.memory_space<vmem>>, %arg9: memref<128x128xbf16, #tpu.memory_space<vmem>>, %arg10: memref<16x128xf32, #tpu.memory_space<vmem>>) attributes {dimension_semantics = [#tpu.dimension_semantics<arbitrary>], iteration_bounds = array<i64: 1>, scalar_prefetch = 0 : i64, scratch_operands = 0 : i64, tpu.core_type = #tpu.core_type<tc>, window_params = [{pipeline_mode = #tpu.pipeline_mode<synchronous>, transform_indices = @transform_0, window_bounds = array<i64: 16, 16>}, {pipeline_mode = #tpu.pipeline_mode<synchronous>, transform_indices = @transform_1, window_bounds = array<i64: 16, 128>}, {pipeline_mode = #tpu.pipeline_mode<synchronous>, transform_indices = @transform_2, window_bounds = array<i64: 16, 1>}, {pipeline_mode = #tpu.pipeline_mode<synchronous>, transform_indices = @transform_3, window_bounds = array<i64: 128, 128>}, {pipeline_mode = #tpu.pipeline_mode<synchronous>, transform_indices = @transform_4, window_bounds = array<i64: 1, 128>}, {pipeline_mode = #tpu.pipeline_mode<synchronous>, transform_indices = @transform_5, window_bounds = array<i64: 128, 128>}, {pipeline_mode = #tpu.pipeline_mode<synchronous>, transform_indices = @transform_6, window_bounds = array<i64: 128, 128>}, {pipeline_mode = #tpu.pipeline_mode<synchronous>, transform_indices = @transform_7, window_bounds = array<i64: 1, 128>}, {pipeline_mode = #tpu.pipeline_mode<synchronous>, transform_indices = @transform_8, window_bounds = array<i64: 128, 128>}, {pipeline_mode = #tpu.pipeline_mode<synchronous>, transform_indices = @transform_9, window_bounds = array<i64: 16, 128>}]} {
    %c0 = arith.constant 0 : index
    %c0_0 = arith.constant 0 : index
    %0 = vector.load %arg1[%c0, %c0_0] : memref<16x16xbf16, #tpu.memory_space<vmem>>, vector<16x16xbf16>
    %c0_1 = arith.constant 0 : index
    %c0_2 = arith.constant 0 : index
    %1 = vector.load %arg2[%c0_1, %c0_2] : memref<16x128xbf16, #tpu.memory_space<vmem>>, vector<16x128xbf16>
    %c0_3 = arith.constant 0 : index
    %c0_4 = arith.constant 0 : index
    %2 = vector.load %arg3[%c0_3, %c0_4] : memref<16x1xf32, #tpu.memory_space<vmem>>, vector<16x1xf32>
    %cst = arith.constant dense<0.000000e+00> : vector<16x128xf32>
    %3 = tpu.matmul %0, %1, %cst {dimension_numbers = #tpu.dot_dimension_numbers<[1], [0], [0], [1], [0, 0, 1, 1], [], []>} : vector<16x16xbf16>, vector<16x128xbf16>, vector<16x128xf32> -> vector<16x128xf32>
    %4 = vector.broadcast %2 : vector<16x1xf32> to vector<16x128xf32>
    %5 = arith.mulf %3, %4 : vector<16x128xf32>
    %6 = arith.truncf %5 : vector<16x128xf32> to vector<16x128xbf16>
    %c0_5 = arith.constant 0 : index
    %c0_6 = arith.constant 0 : index
    %7 = vector.load %arg4[%c0_5, %c0_6] : memref<128x128xbf16, #tpu.memory_space<vmem>>, vector<128x128xbf16>
    %cst_7 = arith.constant dense<0.000000e+00> : vector<16x128xf32>
    %8 = tpu.matmul %6, %7, %cst_7 {dimension_numbers = #tpu.dot_dimension_numbers<[1], [0], [0], [1], [0, 0, 1, 1], [], []>} : vector<16x128xbf16>, vector<128x128xbf16>, vector<16x128xf32> -> vector<16x128xf32>
    %c0_8 = arith.constant 0 : index
    %c0_9 = arith.constant 0 : index
    %9 = vector.load %arg5[%c0_8, %c0_9] : memref<1x128xf32, #tpu.memory_space<vmem>>, vector<1x128xf32>
    %10 = vector.broadcast %9 : vector<1x128xf32> to vector<16x128xf32>
    %11 = arith.addf %8, %10 : vector<16x128xf32>
    %c0_10 = arith.constant 0 : index
    %c0_11 = arith.constant 0 : index
    %12 = vector.load %arg6[%c0_10, %c0_11] : memref<128x128xbf16, #tpu.memory_space<vmem>>, vector<128x128xbf16>
    %cst_12 = arith.constant dense<0.000000e+00> : vector<16x128xf32>
    %13 = tpu.matmul %1, %12, %cst_12 {dimension_numbers = #tpu.dot_dimension_numbers<[1], [0], [0], [1], [0, 0, 1, 1], [], []>} : vector<16x128xbf16>, vector<128x128xbf16>, vector<16x128xf32> -> vector<16x128xf32>
    %14 = arith.addf %11, %13 : vector<16x128xf32>
    %cst_13 = arith.constant 0.000000e+00 : f32
    %15 = vector.broadcast %cst_13 : f32 to vector<16x128xf32>
    %16 = arith.maximumf %14, %15 : vector<16x128xf32>
    %17 = arith.truncf %16 : vector<16x128xf32> to vector<16x128xbf16>
    %cst_14 = arith.constant dense<0.000000e+00> : vector<16x128xf32>
    %18 = tpu.matmul %0, %17, %cst_14 {dimension_numbers = #tpu.dot_dimension_numbers<[1], [0], [0], [1], [0, 0, 1, 1], [], []>} : vector<16x16xbf16>, vector<16x128xbf16>, vector<16x128xf32> -> vector<16x128xf32>
    %19 = vector.broadcast %2 : vector<16x1xf32> to vector<16x128xf32>
    %20 = arith.mulf %18, %19 : vector<16x128xf32>
    %21 = arith.truncf %20 : vector<16x128xf32> to vector<16x128xbf16>
    %c0_15 = arith.constant 0 : index
    %c0_16 = arith.constant 0 : index
    %22 = vector.load %arg7[%c0_15, %c0_16] : memref<128x128xbf16, #tpu.memory_space<vmem>>, vector<128x128xbf16>
    %cst_17 = arith.constant dense<0.000000e+00> : vector<16x128xf32>
    %23 = tpu.matmul %21, %22, %cst_17 {dimension_numbers = #tpu.dot_dimension_numbers<[1], [0], [0], [1], [0, 0, 1, 1], [], []>} : vector<16x128xbf16>, vector<128x128xbf16>, vector<16x128xf32> -> vector<16x128xf32>
    %c0_18 = arith.constant 0 : index
    %c0_19 = arith.constant 0 : index
    %24 = vector.load %arg8[%c0_18, %c0_19] : memref<1x128xf32, #tpu.memory_space<vmem>>, vector<1x128xf32>
    %25 = vector.broadcast %24 : vector<1x128xf32> to vector<16x128xf32>
    %26 = arith.addf %23, %25 : vector<16x128xf32>
    %c0_20 = arith.constant 0 : index
    %c0_21 = arith.constant 0 : index
    %27 = vector.load %arg9[%c0_20, %c0_21] : memref<128x128xbf16, #tpu.memory_space<vmem>>, vector<128x128xbf16>
    %cst_22 = arith.constant dense<0.000000e+00> : vector<16x128xf32>
    %28 = tpu.matmul %17, %27, %cst_22 {dimension_numbers = #tpu.dot_dimension_numbers<[1], [0], [0], [1], [0, 0, 1, 1], [], []>} : vector<16x128xbf16>, vector<128x128xbf16>, vector<16x128xf32> -> vector<16x128xf32>
    %29 = arith.addf %26, %28 : vector<16x128xf32>
    %c0_23 = arith.constant 0 : index
    %c0_24 = arith.constant 0 : index
    %30 = vector.load %arg10[%c0_23, %c0_24] : memref<16x128xf32, #tpu.memory_space<vmem>>, vector<16x128xf32>
    tpu.vector_store %arg10[%c0_23, %c0_24], %29 {strides = array<i32>} : memref<16x128xf32, #tpu.memory_space<vmem>>, vector<16x128xf32>,
    return
  }
  func.func @transform_0(%arg0: i32) -> (i32, i32) {
    %c0_i32 = arith.constant 0 : i32
    %c0_i32_0 = arith.constant 0 : i32
    %c0_i32_1 = arith.constant 0 : i32
    return %c0_i32, %c0_i32_0 : i32, i32
  }
  func.func @transform_1(%arg0: i32) -> (i32, i32) {
    %c0_i32 = arith.constant 0 : i32
    %c0_i32_0 = arith.constant 0 : i32
    %c0_i32_1 = arith.constant 0 : i32
    return %c0_i32, %c0_i32_0 : i32, i32
  }
  func.func @transform_2(%arg0: i32) -> (i32, i32) {
    %c0_i32 = arith.constant 0 : i32
    %c0_i32_0 = arith.constant 0 : i32
    %c0_i32_1 = arith.constant 0 : i32
    return %c0_i32, %c0_i32_0 : i32, i32
  }
  func.func @transform_3(%arg0: i32) -> (i32, i32) {
    %c0_i32 = arith.constant 0 : i32
    %c0_i32_0 = arith.constant 0 : i32
    %c0_i32_1 = arith.constant 0 : i32
    return %c0_i32, %c0_i32_0 : i32, i32
  }
  func.func @transform_4(%arg0: i32) -> (i32, i32) {
    %c0_i32 = arith.constant 0 : i32
    %c0_i32_0 = arith.constant 0 : i32
    %c0_i32_1 = arith.constant 0 : i32
    return %c0_i32, %c0_i32_0 : i32, i32
  }
  func.func @transform_5(%arg0: i32) -> (i32, i32) {
    %c0_i32 = arith.constant 0 : i32
    %c0_i32_0 = arith.constant 0 : i32
    %c0_i32_1 = arith.constant 0 : i32
    return %c0_i32, %c0_i32_0 : i32, i32
  }
  func.func @transform_6(%arg0: i32) -> (i32, i32) {
    %c0_i32 = arith.constant 0 : i32
    %c0_i32_0 = arith.constant 0 : i32
    %c0_i32_1 = arith.constant 0 : i32
    return %c0_i32, %c0_i32_0 : i32, i32
  }
  func.func @transform_7(%arg0: i32) -> (i32, i32) {
    %c0_i32 = arith.constant 0 : i32
    %c0_i32_0 = arith.constant 0 : i32
    %c0_i32_1 = arith.constant 0 : i32
    return %c0_i32, %c0_i32_0 : i32, i32
  }
  func.func @transform_8(%arg0: i32) -> (i32, i32) {
    %c0_i32 = arith.constant 0 : i32
    %c0_i32_0 = arith.constant 0 : i32
    %c0_i32_1 = arith.constant 0 : i32
    return %c0_i32, %c0_i32_0 : i32, i32
  }
  func.func @transform_9(%arg0: i32) -> (i32, i32) {
    %c0_i32 = arith.constant 0 : i32
    %c0_i32_0 = arith.constant 0 : i32
    %c0_i32_1 = arith.constant 0 : i32
    return %c0_i32, %c0_i32_0 : i32, i32
  }
}

</mosaic_0001>

<bundles_post_ra>
// kernel: tpu_custom_call.1
= control target key start
LH: loop header
LB: loop body
LE: loop exit
PB: predicated region body
PF: predicated region fallthrough
CT: control target
= control target key end

     0   :  { %14 = vsyncpa [#allocation3], 0  ;;  %s1247_s0 = inlined_call_operand.vmem [shape: bf16[16,16], index: 0, kind: input, shape index: {}]   ;;  %s1248_s1 = inlined_call_operand.vmem [shape: bf16[16,128], index: 1, kind: input, shape index: {}]   ;;  %s1249_s2 = inlined_call_operand.vmem [shape: f32[16,1], index: 2, kind: input, shape index: {}]   ;;  %s1250_s3 = inlined_call_operand.hbm [shape: bf16[128,128], index: 3, kind: input, shape index: {}]   ;;  %s1251_s4 = inlined_call_operand.vmem [shape: f32[1,128], index: 4, kind: input, shape index: {}]   ;;  %s1252_s5 = inlined_call_operand.hbm [shape: bf16[128,128], index: 5, kind: input, shape index: {}]   ;;  %s1253_s6 = inlined_call_operand.hbm [shape: bf16[128,128], index: 6, kind: input, shape index: {}]   ;;  %s1254_s7 = inlined_call_operand.vmem [shape: f32[1,128], index: 7, kind: input, shape index: {}]   ;;  %s1255_s8 = inlined_call_operand.hbm [shape: bf16[128,128], index: 8, kind: input, shape index: {}]   ;;  %s1256_s9 = inlined_call_operand.hbm [shape: f32[16,128], index: 9, kind: output, shape index: {}]  }
   0x1   :  { %15 = vsyncpa [#allocation6], 0 }
   0x2   :  { %16 = vsyncpa [#allocation9], 0 }
   0x3   :  { %17 = vsyncpa [#allocation4], 0  ;;  %s1017_s30 = smov [#allocation5]   ;;  %s1018_s11 = smov [#allocation2]  }
   0x4   :  { %s43_s10 = sshll.u32 %s1017_s30, 4  ;;  %s29_s12 = sshll.u32 %s1018_s11, 4  ;;  %s44_s10 = int_to_ptr.vmem [resolvable:$true] %s43_s10  ;;  %s1079_s12 = int_to_ptr.vmem [resolvable:$true] %s29_s12 }
   0x5   :  { %s899_s15 = scalar_lea.hbm %s1252_s5, 1024 }
   0x6   :  { %p900_p0 = scmp.ne.s32.totalorder %s1252_s5, %s899_s15  ;;  %p903_p1 = scmp.lt.u32.totalorder %s899_s15, %s1252_s5 }
   0x8   :  { %p905_p2 = pnand %p903_p1, %p900_p0 }
   0xa   :  { %908 = shalt.err (!%p905_p2)
}
   0xb   :  { %s909_s20 = scalar_lea.vmem %s44_s10, 1024  ;;  %p914_p4 = scmp.lt.s32.totalorder %s44_s10, %s44_s10 }
   0xc   :  { %p910_p3 = scmp.ne.s32.totalorder %s44_s10, %s909_s20  ;;  %p915_p5 = scmp.lt.s32.totalorder %s909_s20, %s909_s20 }
   0xe   :  { %p916_p6 = por %p915_p5, %p914_p4 }
  0x10   :  { %p917_p7 = pnand %p916_p6, %p910_p3 }
  0x12   :  { %920 = shalt.err (!%p917_p7)
}
  0x13   :  { %s1019_s21 = smov 64   ;;  %s1020_s22 = smov 4  }
  0x14   :  { %49 = dma.hbm_to_vmem [thread:$0]  %s1252_s5, 1024, %s44_s10, [#allocation6], %s1019_s21, %s1019_s21, %s1020_s22  }
  0x15   :  { %s921_s27 = scalar_lea.hbm %s1250_s3, 1024 }
  0x16   :  { %p922_p8 = scmp.ne.s32.totalorder %s1250_s3, %s921_s27  ;;  %p925_p9 = scmp.lt.u32.totalorder %s921_s27, %s1250_s3 }
  0x18   :  { %p927_p10 = pnand %p925_p9, %p922_p8 }
  0x1a   :  { %930 = shalt.err (!%p927_p10)
}
  0x1b   :  { %s931_s13 = scalar_lea.vmem %s1079_s12, 1024  ;;  %p936_p12 = scmp.lt.s32.totalorder %s1079_s12, %s1079_s12 }
  0x1c   :  { %p932_p11 = scmp.ne.s32.totalorder %s1079_s12, %s931_s13  ;;  %p937_p13 = scmp.lt.s32.totalorder %s931_s13, %s931_s13 }
  0x1e   :  { %p938_p0 = por %p937_p13, %p936_p12 }
  0x20   :  { %p939_p1 = pnand %p938_p0, %p932_p11 }
  0x22   :  { %942 = shalt.err (!%p939_p1)
}
  0x23   :  { %35 = dma.hbm_to_vmem [thread:$0]  %s1250_s3, 1024, %s1079_s12, [#allocation3], %s1019_s21, %s1019_s21, %s1020_s22  }
  0x24   :  { %s1021_s14 = smov [#allocation7]   ;;  %s1022_s16 = smov [#allocation8]  }
  0x25   :  { %s55_s15 = sshll.u32 %s1021_s14, 4  ;;  %s69_s17 = sshll.u32 %s1022_s16, 4  ;;  %s56_s15 = int_to_ptr.vmem [resolvable:$true] %s55_s15  ;;  %s1116_s17 = int_to_ptr.vmem [resolvable:$true] %s69_s17 }
  0x26   :  { %s943_s20 = scalar_lea.hbm %s1253_s6, 1024 }
  0x27   :  { %p944_p2 = scmp.ne.s32.totalorder %s1253_s6, %s943_s20  ;;  %p947_p3 = scmp.lt.u32.totalorder %s943_s20, %s1253_s6 }
  0x29   :  { %p949_p4 = pnand %p947_p3, %p944_p2 }
  0x2b   :  { %952 = shalt.err (!%p949_p4)
}
  0x2c   :  { %s953_s3 = scalar_lea.vmem %s56_s15, 1024  ;;  %p958_p6 = scmp.lt.s32.totalorder %s56_s15, %s56_s15 }
  0x2d   :  { %p954_p5 = scmp.ne.s32.totalorder %s56_s15, %s953_s3  ;;  %p959_p7 = scmp.lt.s32.totalorder %s953_s3, %s953_s3 }
  0x2f   :  { %p960_p8 = por %p959_p7, %p958_p6 }
  0x31   :  { %p961_p9 = pnand %p960_p8, %p954_p5 }
  0x33   :  { %964 = shalt.err (!%p961_p9)
}
  0x34   :  { %61 = dma.hbm_to_vmem [thread:$0]  %s1253_s6, 1024, %s56_s15, [#allocation6], %s1019_s21, %s1019_s21, %s1020_s22  }
  0x35   :  { %s965_s30 = scalar_lea.hbm %s1255_s8, 1024 }
  0x36   :  { %p966_p10 = scmp.ne.s32.totalorder %s1255_s8, %s965_s30  ;;  %p969_p11 = scmp.lt.u32.totalorder %s965_s30, %s1255_s8 }
  0x38   :  { %p971_p12 = pnand %p969_p11, %p966_p10 }
  0x3a   :  { %974 = shalt.err (!%p971_p12)
}
  0x3b   :  { %s975_s14 = scalar_lea.vmem %s1116_s17, 1024  ;;  %p980_p0 = scmp.lt.s32.totalorder %s1116_s17, %s1116_s17 }
  0x3c   :  { %p976_p13 = scmp.ne.s32.totalorder %s1116_s17, %s975_s14  ;;  %p981_p1 = scmp.lt.s32.totalorder %s975_s14, %s975_s14 }
  0x3e   :  { %p982_p2 = por %p981_p1, %p980_p0 }
  0x40   :  { %p983_p3 = pnand %p982_p2, %p976_p13 }
  0x42   :  { %986 = shalt.err (!%p983_p3)
}
  0x43   :  { %75 = dma.hbm_to_vmem [thread:$0]  %s1255_s8, 1024, %s1116_s17, [#allocation9], %s1019_s21, %s1019_s21, %s1020_s22  }
  0x44   :  { %1009 = dma.done.wait [#allocation3], 1024  }
  0x45   :  { %1010 = vsyncadd [#allocation3], 4294966272 }
  0x46   :  { %1011 = dma.done.wait [#allocation6], 2048  }
  0x47   :  { %1012 = vsyncadd [#allocation6], 4294965248 }
  0x48   :  { %1013 = dma.done.wait [#allocation9], 1024  }
  0x49   :  { %1014 = vsyncadd [#allocation9], 4294966272  ;;  %v1023_v0 = vmov 0.0   ;;  %vm1024_vm0 = vmmov 0   ;;  %v1025_v1 = vmov 0   ;;  %v1162_v2 = vld [vmem:[%s1248_s1] sm:$0xff]  }
  0x4a   :  { %748 = vmatprep.subr.bf16.mxu1 %v1023_v0  ;;  %750 = vmatprep.mubr.msk.bf16.mxu1 %vm1024_vm0, %v1023_v0  ;;  %v1167_v3 = vld [vmem:[%s1247_s0] sm:$0xff]   ;;  %vm106_vm1 = vcmask 130048   ;;  %v94_v6 = vld [vmem:[%s1249_s2 + $0x8] sm:$0xff]  ;;  %v869_v8 = vld [vmem:[#allocation2 + $0x10] sm:$0xff]   ;;  %s1026_s23 = smov [#allocation10]  }
  0x4b   :  { %864 = vset.pattern.permute.xlu0 %v1025_v1  ;;  %794 = vmatprep.subr.bf16.mxu0 %v1023_v0  ;;  %v93_v4 = vld [vmem:[%s1249_s2] sm:$0xff]  ;;  %v868_v7 = vld [vmem:[#allocation2 + $0x8] sm:$0xff]   ;;  %v870_v9 = vld [vmem:[#allocation2 + $0x18] sm:$0xff]   ;;  %s656_s24 = sshll.u32 %s1026_s23, 4  ;;  %s657_s24 = int_to_ptr.vmem [resolvable:$true] %s656_s24 }
  0x4c   :  { %796 = vmatprep.mubr.msk.bf16.mxu0 %vm1024_vm0, %v1023_v0  ;;  %749 = vmatpush3.bf16.msra.mxu1 %v1162_v2  ;;  %v867_v5 = vld [vmem:[#allocation2] sm:$0xff]   ;;  %v872_v11 = vld [vmem:[#allocation2 + $0x28] sm:$0xff]   ;;  %v873_v12 = vld [vmem:[#allocation2 + $0x30] sm:$0xff]   ;;  %s987_s25 = scalar_lea.vmem %s657_s24, 256  ;;  %p992_p5 = scmp.lt.s32.totalorder %s657_s24, %s657_s24 }
  0x4d   :  { %153 = vperm.xlu0 %864, %v93_v4   ;;  %754 = vmatprep.subr.bf16.mxu1 %v1023_v0  ;;  %v871_v10 = vld [vmem:[#allocation2 + $0x20] sm:$0xff]   ;;  %v874_v13 = vld [vmem:[#allocation2 + $0x38] sm:$0xff]   ;;  %v876_v24 = vld [vmem:[#allocation5 + $0x8] sm:$0xff]   ;;  %p988_p4 = scmp.ne.s32.totalorder %s657_s24, %s987_s25  ;;  %p993_p6 = scmp.lt.s32.totalorder %s987_s25, %s987_s25 }
  0x4e   :  { %v875_v22 = vld [vmem:[#allocation5] sm:$0xff]   ;;  %v877_v25 = vld [vmem:[#allocation5 + $0x10] sm:$0xff]   ;;  %v878_v26 = vld [vmem:[#allocation5 + $0x18] sm:$0xff]  }
  0x4f   :  { %751 = vmatmul.mubr.msk.bf16.vlgmr.msra.gmra.mrb[0].mxu1 %vm106_vm1, %v1167_v3  ;;  %v879_v27 = vld [vmem:[#allocation5 + $0x20] sm:$0xff]   ;;  %v880_v28 = vld [vmem:[#allocation5 + $0x28] sm:$0xff]   ;;  %v881_v29 = vld [vmem:[#allocation5 + $0x30] sm:$0xff]   ;;  %p994_p7 = por %p993_p6, %p992_p5 }
  0x50   :  { %755 = vmatpush3.bf16.msra.mxu1 %v867_v5  ;;  %770 = vmatprep.mubr.msk.bf16.mxu1 %vm1024_vm0, %v1023_v0  ;;  %v882_v30 = vld [vmem:[#allocation5 + $0x38] sm:$0xff]   ;;  %v673_v31 = vld [vmem:[%s1251_s4] ss:$0 sm:$0xff]  ;;  %v884_v42 = vld [vmem:[#allocation7 + $0x8] sm:$0xff]  }
  0x51   :  { %158 = vperm.xlu0 %864, %v94_v6   ;;  %756 = vmatprep.subr.bf16.mxu1 %v1023_v0  ;;  %v883_v41 = vld [vmem:[#allocation7] sm:$0xff]   ;;  %v885_v43 = vld [vmem:[#allocation7 + $0x10] sm:$0xff]   ;;  %v886_v44 = vld [vmem:[#allocation7 + $0x18] sm:$0xff]   ;;  %p995_p8 = pnand %p994_p7, %p988_p4 }
  0x52   :  { %v887_v45 = vld [vmem:[#allocation7 + $0x20] sm:$0xff]   ;;  %v888_v46 = vld [vmem:[#allocation7 + $0x28] sm:$0xff]   ;;  %v889_v47 = vld [vmem:[#allocation7 + $0x30] sm:$0xff]  }
  0x53   :  { %v890_v48 = vld [vmem:[#allocation7 + $0x38] sm:$0xff]   ;;  %v891_v55 = vld [vmem:[#allocation8] sm:$0xff]   ;;  %v892_v57 = vld [vmem:[#allocation8 + $0x8] sm:$0xff]  }
  0x54   :  { %757 = vmatpush3.bf16.msra.mxu1 %v868_v7  ;;  %v893_v58 = vld [vmem:[#allocation8 + $0x10] sm:$0xff]   ;;  %v894_v59 = vld [vmem:[#allocation8 + $0x18] sm:$0xff]   ;;  %v895_v60 = vld [vmem:[#allocation8 + $0x20] sm:$0xff]  }
  0x55   :  { %758 = vmatprep.subr.bf16.mxu1 %v1023_v0  ;;  %v896_v61 = vld [vmem:[#allocation8 + $0x28] sm:$0xff]   ;;  %v897_v62 = vld [vmem:[#allocation8 + $0x30] sm:$0xff]   ;;  %v898_v63 = vld [vmem:[#allocation8 + $0x38] sm:$0xff]  }
  0x56   :  { %v691_v1 = vld [vmem:[%s1254_s7] ss:$0 sm:$0xff] }
  0x58   :  { %759 = vmatpush3.bf16.msra.mxu1 %v869_v8 }
  0x59   :  { %760 = vmatprep.subr.bf16.mxu1 %v1023_v0 }
  0x5c   :  { %761 = vmatpush3.bf16.msra.mxu1 %v870_v9 }
  0x5d   :  { %762 = vmatprep.subr.bf16.mxu1 %v1023_v0 }
  0x60   :  { %763 = vmatpush3.bf16.msra.mxu1 %v871_v10 }
  0x61   :  { %764 = vmatprep.subr.bf16.mxu1 %v1023_v0 }
  0x64   :  { %765 = vmatpush3.bf16.msra.mxu1 %v872_v11 }
  0x65   :  { %766 = vmatprep.subr.bf16.mxu1 %v1023_v0 }
  0x68   :  { %767 = vmatpush3.bf16.msra.mxu1 %v873_v12 }
  0x69   :  { %768 = vmatprep.subr.bf16.mxu1 %v1023_v0 }
  0x6c   :  { %769 = vmatpush3.bf16.msra.mxu1 %v874_v13 }
  0x6d   :  { %774 = vmatprep.subr.bf16.mxu1 %v1023_v0 }
  0xcc   :  { %v1189_v14 = vpop.permute.xlu0 %153 }
  0xd0   :  { %v1191_v17 = vpop.permute.xlu0 %158 }
 0x122   :  { %v144_v15 = vpop.f32.mrb[0].mxu1 }
 0x123   :  { %v752_v16 = vpop.f32.mrb[1].mxu1  ;;  %v161_v19 = vmul.f32 %v1189_v14, %v144_v15 }
 0x124   :  { %v147_v18 = vpop.f32.mrb[2].mxu1 }
 0x125   :  { %v162_v20 = vmul.f32 %v1191_v17, %v147_v18  ;;  %v753_v21 = vpop.f32.mrb[3].mxu1 }
 0x127   :  { %v163_v23 = vpack.c.bf16 %v162_v20, %v161_v19 }
 0x129   :  { %771 = vmatmul.mubr.bf16.vlgmr.msra.gmra.mrb[4].mxu1 %v163_v23 }
 0x12a   :  { %775 = vmatpush3.bf16.msra.mxu1 %v875_v22  ;;  %790 = vmatprep.mubr.msk.bf16.mxu1 %vm1024_vm0, %v1023_v0 }
 0x12b   :  { %776 = vmatprep.subr.bf16.mxu1 %v1023_v0 }
 0x12e   :  { %777 = vmatpush3.bf16.msra.mxu1 %v876_v24 }
 0x12f   :  { %778 = vmatprep.subr.bf16.mxu1 %v1023_v0 }
 0x132   :  { %779 = vmatpush3.bf16.msra.mxu1 %v877_v25 }
 0x133   :  { %780 = vmatprep.subr.bf16.mxu1 %v1023_v0 }
 0x136   :  { %781 = vmatpush3.bf16.msra.mxu1 %v878_v26 }
 0x137   :  { %782 = vmatprep.subr.bf16.mxu1 %v1023_v0 }
 0x13a   :  { %783 = vmatpush3.bf16.msra.mxu1 %v879_v27 }
 0x13b   :  { %784 = vmatprep.subr.bf16.mxu1 %v1023_v0 }
 0x13e   :  { %785 = vmatpush3.bf16.msra.mxu1 %v880_v28 }
 0x13f   :  { %786 = vmatprep.subr.bf16.mxu1 %v1023_v0 }
 0x142   :  { %787 = vmatpush3.bf16.msra.mxu1 %v881_v29 }
 0x143   :  { %788 = vmatprep.subr.bf16.mxu1 %v1023_v0 }
 0x146   :  { %789 = vmatpush3.bf16.msra.mxu1 %v882_v30 }
 0x149   :  { %791 = vmatmul.mubr.bf16.vlgmr.msra.gmra.mrb[4].mxu1 %v1162_v2 }
 0x21c   :  { %v374_v32 = vpop.f32.mrb[4].mxu1 }
 0x21d   :  { %v840_v33 = vadd.f32 %v673_v31, %v374_v32  ;;  %v792_v34 = vpop.f32.mrb[5].mxu1 }
 0x21e   :  { %v377_v35 = vpop.f32.mrb[6].mxu1 }
 0x21f   :  { %v841_v36 = vadd.f32 %v673_v31, %v377_v35  ;;  %v793_v37 = vpop.f32.mrb[7].mxu1  ;;  %v383_v38 = vmax.f32 %v840_v33, 0.0 }
 0x221   :  { %v384_v39 = vmax.f32 %v841_v36, 0.0 }
 0x223   :  { %v385_v40 = vpack.c.bf16 %v384_v39, %v383_v38 }
 0x225   :  { %795 = vmatpush3.bf16.msra.mxu0 %v385_v40 }
 0x226   :  { %800 = vmatprep.subr.bf16.mxu0 %v1023_v0 }
 0x228   :  { %797 = vmatmul.mubr.msk.bf16.vlgmr.msra.gmra.mrb[0].mxu0 %vm106_vm1, %v1167_v3 }
 0x229   :  { %801 = vmatpush3.bf16.msra.mxu0 %v883_v41  ;;  %816 = vmatprep.mubr.msk.bf16.mxu0 %vm1024_vm0, %v1023_v0 }
 0x22a   :  { %802 = vmatprep.subr.bf16.mxu0 %v1023_v0 }
 0x22d   :  { %803 = vmatpush3.bf16.msra.mxu0 %v884_v42 }
 0x22e   :  { %804 = vmatprep.subr.bf16.mxu0 %v1023_v0 }
 0x231   :  { %805 = vmatpush3.bf16.msra.mxu0 %v885_v43 }
 0x232   :  { %806 = vmatprep.subr.bf16.mxu0 %v1023_v0 }
 0x235   :  { %807 = vmatpush3.bf16.msra.mxu0 %v886_v44 }
 0x236   :  { %808 = vmatprep.subr.bf16.mxu0 %v1023_v0 }
 0x239   :  { %809 = vmatpush3.bf16.msra.mxu0 %v887_v45 }
 0x23a   :  { %810 = vmatprep.subr.bf16.mxu0 %v1023_v0 }
 0x23d   :  { %811 = vmatpush3.bf16.msra.mxu0 %v888_v46 }
 0x23e   :  { %812 = vmatprep.subr.bf16.mxu0 %v1023_v0 }
 0x241   :  { %813 = vmatpush3.bf16.msra.mxu0 %v889_v47 }
 0x242   :  { %814 = vmatprep.subr.bf16.mxu0 %v1023_v0 }
 0x245   :  { %815 = vmatpush3.bf16.msra.mxu0 %v890_v48 }
 0x246   :  { %820 = vmatprep.subr.bf16.mxu0 %v1023_v0 }
 0x2fb   :  { %v420_v49 = vpop.f32.mrb[0].mxu0 }
 0x2fc   :  { %v798_v50 = vpop.f32.mrb[1].mxu0  ;;  %v427_v52 = vmul.f32 %v420_v49, %v1189_v14 }
 0x2fd   :  { %v423_v51 = vpop.f32.mrb[2].mxu0 }
 0x2fe   :  { %v428_v53 = vmul.f32 %v423_v51, %v1191_v17  ;;  %v799_v54 = vpop.f32.mrb[3].mxu0 }
 0x300   :  { %v429_v56 = vpack.c.bf16 %v428_v53, %v427_v52 }
 0x302   :  { %817 = vmatmul.mubr.bf16.vlgmr.msra.gmra.mrb[4].mxu0 %v429_v56 }
 0x303   :  { %821 = vmatpush3.bf16.msra.mxu0 %v891_v55  ;;  %836 = vmatprep.mubr.msk.bf16.mxu0 %vm1024_vm0, %v1023_v0 }
 0x304   :  { %822 = vmatprep.subr.bf16.mxu0 %v1023_v0 }
 0x307   :  { %823 = vmatpush3.bf16.msra.mxu0 %v892_v57 }
 0x308   :  { %824 = vmatprep.subr.bf16.mxu0 %v1023_v0 }
 0x30b   :  { %825 = vmatpush3.bf16.msra.mxu0 %v893_v58 }
 0x30c   :  { %826 = vmatprep.subr.bf16.mxu0 %v1023_v0 }
 0x30f   :  { %827 = vmatpush3.bf16.msra.mxu0 %v894_v59 }
 0x310   :  { %828 = vmatprep.subr.bf16.mxu0 %v1023_v0 }
 0x313   :  { %829 = vmatpush3.bf16.msra.mxu0 %v895_v60 }
 0x314   :  { %830 = vmatprep.subr.bf16.mxu0 %v1023_v0 }
 0x317   :  { %831 = vmatpush3.bf16.msra.mxu0 %v896_v61 }
 0x318   :  { %832 = vmatprep.subr.bf16.mxu0 %v1023_v0 }
 0x31b   :  { %833 = vmatpush3.bf16.msra.mxu0 %v897_v62 }
 0x31c   :  { %834 = vmatprep.subr.bf16.mxu0 %v1023_v0 }
 0x31f   :  { %835 = vmatpush3.bf16.msra.mxu0 %v898_v63 }
 0x322   :  { %837 = vmatmul.mubr.bf16.vlgmr.msra.gmra.mrb[4].mxu0 %v385_v40 }
 0x3f5   :  { %v640_v2 = vpop.f32.mrb[4].mxu0 }
 0x3f6   :  { %v842_v3 = vadd.f32 %v691_v1, %v640_v2  ;;  %v838_v4 = vpop.f32.mrb[5].mxu0 }
 0x3f7   :  { %v643_v5 = vpop.f32.mrb[6].mxu0 }
 0x3f8   :  { %649 = vst [vmem:[#allocation10] sm:$0xff] %v842_v3  ;;  %v843_v6 = vadd.f32 %v691_v1, %v643_v5  ;;  %v839_v7 = vpop.f32.mrb[7].mxu0 }
 0x3fa   :  { %650 = vst [vmem:[#allocation10 + $0x8] sm:$0xff] %v843_v6 }
 0x3fb   :  { %998 = shalt.err (!%p995_p8)
}
 0x3fc   :  { %s999_s3 = scalar_lea.hbm %s1256_s9, 256 }
 0x3fd   :  { %p1000_p9 = scmp.ne.s32.totalorder %s1256_s9, %s999_s3  ;;  %p1003_p10 = scmp.lt.u32.totalorder %s999_s3, %s1256_s9 }
 0x3ff   :  { %p1005_p11 = pnand %p1003_p10, %p1000_p9 }
 0x401   :  { %1008 = shalt.err (!%p1005_p11)
}
 0x402   :  { %s1027_s30 = smov 128   ;;  %s1028_s11 = smov 8  }
 0x403   :  { %662 = dma.vmem_to_hbm [thread:$0]  %s657_s24, 256, %s1256_s9, [#allocation4], %s1027_s30, %s1027_s30, %s1028_s11  }
 0x404   :  { %1015 = dma.done.wait [#allocation4], 256  }
 0x405   :  { %1016 = vsyncadd [#allocation4], 4294967040 }
 0x406   :  { %666 = vsyncpa [#allocation3], 1 }
 0x407   :  { %667 = vsyncpa [#allocation6], 1 }
 0x408   :  { %668 = vsyncpa [#allocation9], 1 }
 0x409   :  { %669 = vsyncpa [#allocation4], 1 }

</bundles_post_ra>
